<compile_context>
chip_gen: v7x
topology: tpu7x:2x2x1
jax: 0.10.0
libtpu: 0.0.40
codegen_flags: <defaults>
</compile_context>

<pallas_src>
import functools

import jax
import jax.numpy as jnp
from jax.experimental import pallas as pl
from jax.experimental.pallas import tpu as pltpu

STATE_SPACE_SIZE = 16
ACTION_SPACE_SIZE = 2
HIDDEN = 64
OUT_PAD = 128  # lane-dense padded output width (native MXU / lane width)


def qnet_kernel(x_ref, w1_ref, b1_ref, w2_ref, b2_ref, w3_ref, b3_ref, out_ref):
    # x: (TB, 16) bf16; weights bf16; biases f32; out: (TB, 128) f32
    x = x_ref[...]

    # dense1 + relu (f32 accumulate, f32 bias/ReLU, cast once for next MXU pass)
    h1 = jnp.dot(x, w1_ref[...], preferred_element_type=jnp.float32) + b1_ref[...]
    h1 = jnp.maximum(h1, 0.0).astype(jnp.bfloat16)

    # dense2 + relu
    h2 = jnp.dot(h1, w2_ref[...], preferred_element_type=jnp.float32) + b2_ref[...]
    h2 = jnp.maximum(h2, 0.0).astype(jnp.bfloat16)

    # output layer (padded to 128 lanes; no activation)
    out_ref[...] = (
        jnp.dot(h2, w3_ref[...], preferred_element_type=jnp.float32) + b3_ref[...]
    ).astype(out_ref.dtype)


def qnetwork_forward(state, params, *, tb=None):
    """state: (B, d1, d2) with d1*d2 == STATE_SPACE_SIZE (matches torch .view)."""
    B = state.shape[0]
    feat = state.shape[1] * state.shape[2]
    assert feat == STATE_SPACE_SIZE

    w1, b1, w2, b2, w3, b3 = params

    # --- tile-size selection (multiple of 8; 512-2048 sweet spot at large B,
    #     small batches just round up to 8). Fits easily in v7x's 32 MiB scoped
    #     VMEM: 2*(TB*16*2B) x + 2*(TB*128*4B) out + ~21 KB weights.
    if tb is None:
        tb = 1024 if B >= 1024 else max(8, ((B + 7) // 8) * 8)
    n_tiles = pl.cdiv(B, tb)
    Bp = n_tiles * tb

    # --- activations: bf16, zero-pad batch to a multiple of TB
    x = state.reshape(B, feat).astype(jnp.bfloat16)
    if Bp != B:
        x = jnp.pad(x, ((0, Bp - B), (0, 0)))

    # --- weights: bf16; biases: f32 (added to the f32 accumulator)
    w1b = w1.astype(jnp.bfloat16)
    w2b = w2.astype(jnp.bfloat16)
    b1f = b1.astype(jnp.float32)
    b2f = b2.astype(jnp.float32)
    # last layer padded to 128 output lanes for lane-dense stores
    w3p = jnp.zeros((HIDDEN, OUT_PAD), jnp.bfloat16).at[:, :ACTION_SPACE_SIZE].set(
        w3.astype(jnp.bfloat16))
    b3p = jnp.zeros((1, OUT_PAD), jnp.float32).at[:, :ACTION_SPACE_SIZE].set(
        b3.astype(jnp.float32))

    # constant index_map -> parameters stay resident in VMEM across grid steps
    const2d = lambda shp: pl.BlockSpec(shp, lambda i: (0, 0))

    flops = 2 * Bp * (feat * HIDDEN + HIDDEN * HIDDEN + HIDDEN * OUT_PAD)
    bytes_accessed = (
        Bp * feat * 2            # x (bf16)
        + Bp * OUT_PAD * 4       # padded output (f32)
        + (feat * HIDDEN + HIDDEN * HIDDEN + HIDDEN * OUT_PAD) * 2  # weights
        + (HIDDEN + HIDDEN + OUT_PAD) * 4                            # biases
    )

    out = pl.pallas_call(
        qnet_kernel,
        out_shape=jax.ShapeDtypeStruct((Bp, OUT_PAD), jnp.float32),
        grid=(n_tiles,),
        in_specs=[
            pl.BlockSpec((tb, feat), lambda i: (i, 0)),   # streamed x tiles
            const2d(w1b.shape), const2d(b1f.shape),
            const2d(w2b.shape), const2d(b2f.shape),
            const2d(w3p.shape), const2d(b3p.shape),
        ],
        out_specs=pl.BlockSpec((tb, OUT_PAD), lambda i: (i, 0)),
        compiler_params=pltpu.CompilerParams(
            dimension_semantics=("parallel",)),
        cost_estimate=pl.CostEstimate(
            flops=flops, transcendentals=0, bytes_accessed=bytes_accessed),
    )(x, w1b, b1f, w2b, b2f, w3p, b3p)

    # drop batch padding and the zero-padded output lanes
    return out[:B, :ACTION_SPACE_SIZE]


def init_params(key):
    """Deterministic synthetic parameters (PyTorch Linear shapes, stored transposed)."""
    k1, k2, k3, k4, k5, k6 = jax.random.split(key, 6)
    # nn.Linear(state, 64): weight (64,16) -> stored (16,64); bias (64,) -> (1,64)
    w1 = jax.random.normal(k1, (STATE_SPACE_SIZE, HIDDEN), jnp.float32) * 0.1
    b1 = jax.random.normal(k2, (1, HIDDEN), jnp.float32) * 0.1
    # nn.Linear(64, 64)
    w2 = jax.random.normal(k3, (HIDDEN, HIDDEN), jnp.float32) * 0.1
    b2 = jax.random.normal(k4, (1, HIDDEN), jnp.float32) * 0.1
    # nn.Linear(64, action_choice_space_size=2)
    w3 = jax.random.normal(k5, (HIDDEN, ACTION_SPACE_SIZE), jnp.float32) * 0.1
    b3 = jax.random.normal(k6, (1, ACTION_SPACE_SIZE), jnp.float32) * 0.1
    return w1, b1, w2, b2, w3, b3


def reference_forward(state, params):
    """Pure-JAX f32 reference matching the PyTorch module."""
    w1, b1, w2, b2, w3, b3 = params
    x = state.reshape(state.shape[0], -1).astype(jnp.float32)
    h1 = jnp.maximum(x @ w1 + b1, 0.0)
    h2 = jnp.maximum(h1 @ w2 + b2, 0.0)
    return h2 @ w3 + b3


if __name__ == "__main__":
    key = jax.random.PRNGKey(0)
    pkey, xkey = jax.random.split(key)
    params = init_params(pkey)

    # state: (batch=2, 4, 4) -> flattened to (2, 16) inside forward (torch .view)
    state = jax.random.normal(xkey, (2, 4, 4), jnp.float32)

    out = qnetwork_forward(state, params)
    out = jax.block_until_ready(out)

    ref = reference_forward(state, params)
    assert out.shape == (2, ACTION_SPACE_SIZE)
    # bf16 activations/weights with f32 accumulation -> ~1e-2 level agreement
    assert jnp.allclose(out, ref, atol=5e-2, rtol=5e-2), (out, ref)
    print("KERNEL_OK")
</pallas_src>

<mosaic_0001>
module attributes {stable_mosaic.version = 11 : i64} {
  func.func @qnet_kernel(%arg0: i32, %arg1: memref<8x16xbf16, #tpu.memory_space<vmem>>, %arg2: memref<16x64xbf16, #tpu.memory_space<vmem>>, %arg3: memref<1x64xf32, #tpu.memory_space<vmem>>, %arg4: memref<64x64xbf16, #tpu.memory_space<vmem>>, %arg5: memref<1x64xf32, #tpu.memory_space<vmem>>, %arg6: memref<64x128xbf16, #tpu.memory_space<vmem>>, %arg7: memref<1x128xf32, #tpu.memory_space<vmem>>, %arg8: memref<8x128xf32, #tpu.memory_space<vmem>>) attributes {dimension_semantics = [#tpu.dimension_semantics<parallel>], iteration_bounds = array<i64: 1>, scalar_prefetch = 0 : i64, scratch_operands = 0 : i64, tpu.core_type = #tpu.core_type<tc>, window_params = [{transform_indices = @transform_0, window_bounds = array<i64: 8, 16>}, {pipeline_mode = #tpu.pipeline_mode<synchronous>, transform_indices = @transform_1, window_bounds = array<i64: 16, 64>}, {pipeline_mode = #tpu.pipeline_mode<synchronous>, transform_indices = @transform_2, window_bounds = array<i64: 1, 64>}, {pipeline_mode = #tpu.pipeline_mode<synchronous>, transform_indices = @transform_3, window_bounds = array<i64: 64, 64>}, {pipeline_mode = #tpu.pipeline_mode<synchronous>, transform_indices = @transform_4, window_bounds = array<i64: 1, 64>}, {pipeline_mode = #tpu.pipeline_mode<synchronous>, transform_indices = @transform_5, window_bounds = array<i64: 64, 128>}, {pipeline_mode = #tpu.pipeline_mode<synchronous>, transform_indices = @transform_6, window_bounds = array<i64: 1, 128>}, {transform_indices = @transform_7, window_bounds = array<i64: 8, 128>}]} {
    %c0 = arith.constant 0 : index
    %c0_0 = arith.constant 0 : index
    %0 = vector.load %arg1[%c0, %c0_0] : memref<8x16xbf16, #tpu.memory_space<vmem>>, vector<8x16xbf16>
    %c0_1 = arith.constant 0 : index
    %c0_2 = arith.constant 0 : index
    %1 = vector.load %arg2[%c0_1, %c0_2] : memref<16x64xbf16, #tpu.memory_space<vmem>>, vector<16x64xbf16>
    %cst = arith.constant dense<0.000000e+00> : vector<8x64xf32>
    %2 = tpu.matmul %0, %1, %cst {dimension_numbers = #tpu.dot_dimension_numbers<[1], [0], [0], [1], [0, 0, 1, 1], [], []>} : vector<8x16xbf16>, vector<16x64xbf16>, vector<8x64xf32> -> vector<8x64xf32>
    %c0_3 = arith.constant 0 : index
    %c0_4 = arith.constant 0 : index
    %3 = vector.load %arg3[%c0_3, %c0_4] : memref<1x64xf32, #tpu.memory_space<vmem>>, vector<1x64xf32>
    %4 = vector.broadcast %3 : vector<1x64xf32> to vector<8x64xf32>
    %5 = arith.addf %2, %4 : vector<8x64xf32>
    %cst_5 = arith.constant 0.000000e+00 : f32
    %6 = vector.broadcast %cst_5 : f32 to vector<8x64xf32>
    %7 = arith.maximumf %5, %6 : vector<8x64xf32>
    %8 = arith.truncf %7 : vector<8x64xf32> to vector<8x64xbf16>
    %c0_6 = arith.constant 0 : index
    %c0_7 = arith.constant 0 : index
    %9 = vector.load %arg4[%c0_6, %c0_7] : memref<64x64xbf16, #tpu.memory_space<vmem>>, vector<64x64xbf16>
    %cst_8 = arith.constant dense<0.000000e+00> : vector<8x64xf32>
    %10 = tpu.matmul %8, %9, %cst_8 {dimension_numbers = #tpu.dot_dimension_numbers<[1], [0], [0], [1], [0, 0, 1, 1], [], []>} : vector<8x64xbf16>, vector<64x64xbf16>, vector<8x64xf32> -> vector<8x64xf32>
    %c0_9 = arith.constant 0 : index
    %c0_10 = arith.constant 0 : index
    %11 = vector.load %arg5[%c0_9, %c0_10] : memref<1x64xf32, #tpu.memory_space<vmem>>, vector<1x64xf32>
    %12 = vector.broadcast %11 : vector<1x64xf32> to vector<8x64xf32>
    %13 = arith.addf %10, %12 : vector<8x64xf32>
    %cst_11 = arith.constant 0.000000e+00 : f32
    %14 = vector.broadcast %cst_11 : f32 to vector<8x64xf32>
    %15 = arith.maximumf %13, %14 : vector<8x64xf32>
    %16 = arith.truncf %15 : vector<8x64xf32> to vector<8x64xbf16>
    %c0_12 = arith.constant 0 : index
    %c0_13 = arith.constant 0 : index
    %17 = vector.load %arg6[%c0_12, %c0_13] : memref<64x128xbf16, #tpu.memory_space<vmem>>, vector<64x128xbf16>
    %cst_14 = arith.constant dense<0.000000e+00> : vector<8x128xf32>
    %18 = tpu.matmul %16, %17, %cst_14 {dimension_numbers = #tpu.dot_dimension_numbers<[1], [0], [0], [1], [0, 0, 1, 1], [], []>} : vector<8x64xbf16>, vector<64x128xbf16>, vector<8x128xf32> -> vector<8x128xf32>
    %c0_15 = arith.constant 0 : index
    %c0_16 = arith.constant 0 : index
    %19 = vector.load %arg7[%c0_15, %c0_16] : memref<1x128xf32, #tpu.memory_space<vmem>>, vector<1x128xf32>
    %20 = vector.broadcast %19 : vector<1x128xf32> to vector<8x128xf32>
    %21 = arith.addf %18, %20 : vector<8x128xf32>
    %c0_17 = arith.constant 0 : index
    %c0_18 = arith.constant 0 : index
    %22 = vector.load %arg8[%c0_17, %c0_18] : memref<8x128xf32, #tpu.memory_space<vmem>>, vector<8x128xf32>
    tpu.vector_store %arg8[%c0_17, %c0_18], %21 {strides = array<i32>} : memref<8x128xf32, #tpu.memory_space<vmem>>, vector<8x128xf32>,
    return
  }
  func.func @transform_0(%arg0: i32) -> (i32, i32) {
    %c0_i32 = arith.constant 0 : i32
    %c0_i32_0 = arith.constant 0 : i32
    return %arg0, %c0_i32 : i32, i32
  }
  func.func @transform_1(%arg0: i32) -> (i32, i32) {
    %c0_i32 = arith.constant 0 : i32
    %c0_i32_0 = arith.constant 0 : i32
    %c0_i32_1 = arith.constant 0 : i32
    return %c0_i32, %c0_i32_0 : i32, i32
  }
  func.func @transform_2(%arg0: i32) -> (i32, i32) {
    %c0_i32 = arith.constant 0 : i32
    %c0_i32_0 = arith.constant 0 : i32
    %c0_i32_1 = arith.constant 0 : i32
    return %c0_i32, %c0_i32_0 : i32, i32
  }
  func.func @transform_3(%arg0: i32) -> (i32, i32) {
    %c0_i32 = arith.constant 0 : i32
    %c0_i32_0 = arith.constant 0 : i32
    %c0_i32_1 = arith.constant 0 : i32
    return %c0_i32, %c0_i32_0 : i32, i32
  }
  func.func @transform_4(%arg0: i32) -> (i32, i32) {
    %c0_i32 = arith.constant 0 : i32
    %c0_i32_0 = arith.constant 0 : i32
    %c0_i32_1 = arith.constant 0 : i32
    return %c0_i32, %c0_i32_0 : i32, i32
  }
  func.func @transform_5(%arg0: i32) -> (i32, i32) {
    %c0_i32 = arith.constant 0 : i32
    %c0_i32_0 = arith.constant 0 : i32
    %c0_i32_1 = arith.constant 0 : i32
    return %c0_i32, %c0_i32_0 : i32, i32
  }
  func.func @transform_6(%arg0: i32) -> (i32, i32) {
    %c0_i32 = arith.constant 0 : i32
    %c0_i32_0 = arith.constant 0 : i32
    %c0_i32_1 = arith.constant 0 : i32
    return %c0_i32, %c0_i32_0 : i32, i32
  }
  func.func @transform_7(%arg0: i32) -> (i32, i32) {
    %c0_i32 = arith.constant 0 : i32
    %c0_i32_0 = arith.constant 0 : i32
    return %arg0, %c0_i32 : i32, i32
  }
}

</mosaic_0001>

<bundles_post_ra>
// kernel: tpu_custom_call.1
= control target key start
LH: loop header
LB: loop body
LE: loop exit
PB: predicated region body
PF: predicated region fallthrough
CT: control target
= control target key end

     0   :  { %12 = vsyncpa [#allocation3], 0  ;;  %s650_s0 = inlined_call_operand.hbm [shape: bf16[8,16], index: 0, kind: input, shape index: {}]   ;;  %s651_s1 = inlined_call_operand.hbm [shape: bf16[16,64], index: 1, kind: input, shape index: {}]   ;;  %s652_s2 = inlined_call_operand.vmem [shape: f32[1,64], index: 2, kind: input, shape index: {}]   ;;  %s653_s3 = inlined_call_operand.hbm [shape: bf16[64,64], index: 3, kind: input, shape index: {}]   ;;  %s654_s4 = inlined_call_operand.vmem [shape: f32[1,64], index: 4, kind: input, shape index: {}]   ;;  %s655_s5 = inlined_call_operand.hbm [shape: bf16[64,128], index: 5, kind: input, shape index: {}]   ;;  %s656_s6 = inlined_call_operand.vmem [shape: f32[1,128], index: 6, kind: input, shape index: {}]   ;;  %s657_s7 = inlined_call_operand.hbm [shape: f32[8,128], index: 7, kind: output, shape index: {}]  }
   0x1   :  { %13 = vsyncpa [#allocation6], 0 }
   0x2   :  { %14 = vsyncpa [#allocation9], 0 }
   0x3   :  { %15 = vsyncpa [#allocation4], 0  ;;  %s521_s24 = smov [#allocation5]   ;;  %s403_s28 = scalar_lea.hbm %s651_s1, 128 }
   0x4   :  { %s31_s25 = sshll.u32 %s521_s24, 4  ;;  %p404_p0 = scmp.ne.s32.totalorder %s651_s1, %s403_s28  ;;  %s32_s25 = int_to_ptr.vmem [resolvable:$true] %s31_s25 }
   0x5   :  { %p407_p1 = scmp.lt.u32.totalorder %s403_s28, %s651_s1 }
   0x7   :  { %p409_p2 = pnand %p407_p1, %p404_p0 }
   0x9   :  { %412 = shalt.err (!%p409_p2)
}
   0xa   :  { %s413_s10 = scalar_lea.vmem %s32_s25, 128  ;;  %p418_p4 = scmp.lt.s32.totalorder %s32_s25, %s32_s25 }
   0xb   :  { %p414_p3 = scmp.ne.s32.totalorder %s32_s25, %s413_s10  ;;  %p419_p5 = scmp.lt.s32.totalorder %s413_s10, %s413_s10 }
   0xd   :  { %p420_p6 = por %p419_p5, %p418_p4 }
   0xf   :  { %p421_p7 = pnand %p420_p6, %p414_p3 }
  0x11   :  { %424 = shalt.err (!%p421_p7)
}
  0x12   :  { %s522_s11 = smov 64   ;;  %s523_s12 = smov 4  }
  0x13   :  { %37 = dma.hbm_to_vmem [thread:$0]  %s651_s1, 128, %s32_s25, [#allocation6], %s522_s11, %s522_s11, %s523_s12  }
  0x14   :  { %s524_s15 = smov [#allocation2]   ;;  %s525_s17 = smov [#allocation7]  }
  0x15   :  { %s22_s16 = sshll.u32 %s524_s15, 4  ;;  %s45_s18 = sshll.u32 %s525_s17, 4  ;;  %s23_s16 = int_to_ptr.vmem [resolvable:$true] %s22_s16  ;;  %s46_s18 = int_to_ptr.vmem [resolvable:$true] %s45_s18 }
  0x16   :  { %s425_s21 = scalar_lea.hbm %s650_s0, 64 }
  0x17   :  { %p426_p8 = scmp.ne.s32.totalorder %s650_s0, %s425_s21  ;;  %p429_p9 = scmp.lt.u32.totalorder %s425_s21, %s650_s0 }
  0x19   :  { %p431_p10 = pnand %p429_p9, %p426_p8 }
  0x1b   :  { %434 = shalt.err (!%p431_p10)
}
  0x1c   :  { %s435_s1 = scalar_lea.vmem %s23_s16, 64  ;;  %p440_p12 = scmp.lt.s32.totalorder %s23_s16, %s23_s16 }
  0x1d   :  { %p436_p11 = scmp.ne.s32.totalorder %s23_s16, %s435_s1  ;;  %p441_p13 = scmp.lt.s32.totalorder %s435_s1, %s435_s1 }
  0x1f   :  { %p442_p0 = por %p441_p13, %p440_p12 }
  0x21   :  { %p443_p1 = pnand %p442_p0, %p436_p11 }
  0x23   :  { %446 = shalt.err (!%p443_p1)
}
  0x24   :  { %25 = dma.hbm_to_vmem [thread:$0]  %s650_s0, 64, %s23_s16, [#allocation3]  }
  0x25   :  { %s447_s30 = scalar_lea.hbm %s653_s3, 512 }
  0x26   :  { %p448_p2 = scmp.ne.s32.totalorder %s653_s3, %s447_s30  ;;  %p451_p3 = scmp.lt.u32.totalorder %s447_s30, %s653_s3 }
  0x28   :  { %p453_p4 = pnand %p451_p3, %p448_p2 }
  0x2a   :  { %456 = shalt.err (!%p453_p4)
}
  0x2b   :  { %s457_s14 = scalar_lea.vmem %s46_s18, 512  ;;  %p462_p6 = scmp.lt.s32.totalorder %s46_s18, %s46_s18 }
  0x2c   :  { %p458_p5 = scmp.ne.s32.totalorder %s46_s18, %s457_s14  ;;  %p463_p7 = scmp.lt.s32.totalorder %s457_s14, %s457_s14 }
  0x2e   :  { %p464_p8 = por %p463_p7, %p462_p6 }
  0x30   :  { %p465_p9 = pnand %p464_p8, %p458_p5 }
  0x32   :  { %468 = shalt.err (!%p465_p9)
}
  0x33   :  { %51 = dma.hbm_to_vmem [thread:$0]  %s653_s3, 512, %s46_s18, [#allocation6], %s522_s11, %s522_s11, %s523_s12  }
  0x34   :  { %s526_s16 = smov [#allocation8]   ;;  %s469_s21 = scalar_lea.hbm %s655_s5, 512 }
  0x35   :  { %s59_s17 = sshll.u32 %s526_s16, 4  ;;  %p470_p10 = scmp.ne.s32.totalorder %s655_s5, %s469_s21  ;;  %s60_s17 = int_to_ptr.vmem [resolvable:$true] %s59_s17 }
  0x36   :  { %p473_p11 = scmp.lt.u32.totalorder %s469_s21, %s655_s5 }
  0x38   :  { %p475_p12 = pnand %p473_p11, %p470_p10 }
  0x3a   :  { %478 = shalt.err (!%p475_p12)
}
  0x3b   :  { %s479_s1 = scalar_lea.vmem %s60_s17, 512  ;;  %p484_p0 = scmp.lt.s32.totalorder %s60_s17, %s60_s17 }
  0x3c   :  { %p480_p13 = scmp.ne.s32.totalorder %s60_s17, %s479_s1  ;;  %p485_p1 = scmp.lt.s32.totalorder %s479_s1, %s479_s1 }
  0x3e   :  { %p486_p2 = por %p485_p1, %p484_p0 }
  0x40   :  { %p487_p3 = pnand %p486_p2, %p480_p13 }
  0x42   :  { %490 = shalt.err (!%p487_p3)
}
  0x43   :  { %65 = dma.hbm_to_vmem [thread:$0]  %s655_s5, 512, %s60_s17, [#allocation9], %s522_s11, %s522_s11, %s523_s12  }
  0x44   :  { %513 = dma.done.wait [#allocation3], 64  }
  0x45   :  { %514 = vsyncadd [#allocation3], 4294967232 }
  0x46   :  { %515 = dma.done.wait [#allocation6], 640  }
  0x47   :  { %516 = vsyncadd [#allocation6], 4294966656 }
  0x48   :  { %517 = dma.done.wait [#allocation9], 512  }
  0x49   :  { %518 = vsyncadd [#allocation9], 4294966784  ;;  %v527_v0 = vmov 0.0   ;;  %vm528_vm0 = vmmov 0   ;;  %v394_v1 = vld [vmem:[#allocation5] sm:$0xff]   ;;  %vm97_vm1 = vcmask 130048  }
  0x4a   :  { %355 = vmatprep.subr.bf16.mxu0 %v527_v0  ;;  %357 = vmatprep.mubr.msk.bf16.mxu0 %vm528_vm0, %v527_v0  ;;  %v81_v2 = vld [vmem:[#allocation2] sm:$0xf]  ;;  %v395_v3 = vld [vmem:[#allocation7] sm:$0xff]   ;;  %v396_v4 = vld [vmem:[#allocation7 + $0x8] sm:$0xff]   ;;  %vm182_vm2 = vcmask 523264   ;;  %s529_s28 = smov [#allocation10]  }
  0x4b   :  { %361 = vmatprep.subr.bf16.mxu1 %v527_v0  ;;  %369 = vmatprep.mubr.msk.bf16.mxu1 %vm528_vm0, %v527_v0  ;;  %v397_v5 = vld [vmem:[#allocation7 + $0x10] sm:$0xff]   ;;  %v398_v6 = vld [vmem:[#allocation7 + $0x18] sm:$0xff]   ;;  %v399_v7 = vld [vmem:[#allocation8] sm:$0xff]   ;;  %s317_s29 = sshll.u32 %s529_s28, 4  ;;  %s318_s29 = int_to_ptr.vmem [resolvable:$true] %s317_s29 }
  0x4c   :  { %356 = vmatpush3.bf16.msra.mxu0 %v394_v1  ;;  %362 = vmatpush3.bf16.msra.mxu1 %v395_v3  ;;  %v400_v8 = vld [vmem:[#allocation8 + $0x8] sm:$0xff]   ;;  %v328_v9 = vld [vmem:[%s652_s2] ss:$0 sm:$0xff]  ;;  %v402_v18 = vld [vmem:[#allocation8 + $0x18] sm:$0xff]   ;;  %p496_p5 = scmp.lt.s32.totalorder %s318_s29, %s318_s29 }
  0x4d   :  { %373 = vmatprep.subr.bf16.mxu0 %v527_v0  ;;  %363 = vmatprep.subr.bf16.mxu1 %v527_v0  ;;  %v401_v17 = vld [vmem:[#allocation8 + $0x10] sm:$0xff]  }
  0x4e   :  { %v331_v19 = vld [vmem:[%s654_s4] ss:$0 sm:$0xff]  ;;  %s491_s4 = scalar_lea.vmem %s318_s29, 128 }
  0x4f   :  { %358 = vmatmul.mubr.msk.bf16.vlgmr.msra.gmra.mrb[0].mxu0 %vm97_vm1, %v81_v2  ;;  %v337_v27 = vld [vmem:[%s656_s6] ss:$0 sm:$0xff]  ;;  %p492_p4 = scmp.ne.s32.totalorder %s318_s29, %s491_s4  ;;  %p497_p6 = scmp.lt.s32.totalorder %s491_s4, %s491_s4 }
  0x50   :  { %381 = vmatprep.mubr.msk.bf16.mxu0 %vm528_vm0, %v527_v0  ;;  %364 = vmatpush3.bf16.msra.mxu1 %v396_v4 }
  0x51   :  { %365 = vmatprep.subr.bf16.mxu1 %v527_v0  ;;  %374 = vmatpush3.bf16.msra.mxu0 %v399_v7  ;;  %p498_p7 = por %p497_p6, %p496_p5 }
  0x52   :  { %375 = vmatprep.subr.bf16.mxu0 %v527_v0 }
  0x53   :  { %p499_p8 = pnand %p498_p7, %p492_p4 }
  0x54   :  { %366 = vmatpush3.bf16.msra.mxu1 %v397_v5 }
  0x55   :  { %367 = vmatprep.subr.bf16.mxu1 %v527_v0  ;;  %376 = vmatpush3.bf16.msra.mxu0 %v400_v8 }
  0x56   :  { %377 = vmatprep.subr.bf16.mxu0 %v527_v0 }
  0x58   :  { %368 = vmatpush3.bf16.msra.mxu1 %v398_v6 }
  0x59   :  { %378 = vmatpush3.bf16.msra.mxu0 %v401_v17 }
  0x5a   :  { %379 = vmatprep.subr.bf16.mxu0 %v527_v0 }
  0x5d   :  { %380 = vmatpush3.bf16.msra.mxu0 %v402_v18 }
 0x122   :  { %v135_v10 = vpop.f32.mrb[0].mxu0 }
 0x123   :  { %v136_v11 = vadd.f32 %v328_v9, %v135_v10  ;;  %v359_v12 = vpop.f32.mrb[1].mxu0 }
 0x124   :  { %v138_v13 = vpop.f32.mrb[2].mxu0 }
 0x125   :  { %v141_v14 = vmax.f32 %v136_v11, 0.0  ;;  %v360_v15 = vpop.f32.mrb[3].mxu0 }
 0x127   :  { %v142_v16 = vpack.c.bf16 %v141_v14, %v141_v14 }
 0x129   :  { %370 = vmatmul.mubr.msk.bf16.vlgmr.msra.gmra.mrb[0].mxu1 %vm182_vm2, %v142_v16 }
 0x1fc   :  { %v220_v20 = vpop.f32.mrb[0].mxu1 }
 0x1fd   :  { %v221_v21 = vadd.f32 %v331_v19, %v220_v20  ;;  %v371_v22 = vpop.f32.mrb[1].mxu1 }
 0x1fe   :  { %v223_v23 = vpop.f32.mrb[2].mxu1 }
 0x1ff   :  { %v226_v24 = vmax.f32 %v221_v21, 0.0  ;;  %v372_v25 = vpop.f32.mrb[3].mxu1 }
 0x201   :  { %v227_v26 = vpack.c.bf16 %v226_v24, %v226_v24 }
 0x203   :  { %382 = vmatmul.mubr.msk.bf16.vlgmr.msra.gmra.mrb[4].mxu0 %vm182_vm2, %v227_v26 }
 0x2d6   :  { %v304_v28 = vpop.f32.mrb[4].mxu0 }
 0x2d7   :  { %v305_v29 = vadd.f32 %v337_v27, %v304_v28  ;;  %v383_v30 = vpop.f32.mrb[5].mxu0 }
 0x2d8   :  { %v307_v31 = vpop.f32.mrb[6].mxu0 }
 0x2d9   :  { %310 = vst [vmem:[#allocation10] sm:$0xff] %v305_v29  ;;  %v384_v32 = vpop.f32.mrb[7].mxu0 }
 0x2da   :  { %502 = shalt.err (!%p499_p8)
}
 0x2db   :  { %s503_s6 = scalar_lea.hbm %s657_s7, 128 }
 0x2dc   :  { %p504_p9 = scmp.ne.s32.totalorder %s657_s7, %s503_s6  ;;  %p507_p10 = scmp.lt.u32.totalorder %s503_s6, %s657_s7 }
 0x2de   :  { %p509_p11 = pnand %p507_p10, %p504_p9 }
 0x2e0   :  { %512 = shalt.err (!%p509_p11)
}
 0x2e1   :  { %320 = dma.vmem_to_hbm [thread:$0]  %s318_s29, 128, %s657_s7, [#allocation4]  }
 0x2e2   :  { %519 = dma.done.wait [#allocation4], 128  }
 0x2e3   :  { %520 = vsyncadd [#allocation4], 4294967168 }
 0x2e4   :  { %324 = vsyncpa [#allocation3], 1 }
 0x2e5   :  { %325 = vsyncpa [#allocation6], 1 }
 0x2e6   :  { %326 = vsyncpa [#allocation9], 1 }
 0x2e7   :  { %327 = vsyncpa [#allocation4], 1 }

</bundles_post_ra>
